<compile_context>
chip_gen: v5e
topology: v5e:2x2
jax: 0.10.0
libtpu: 0.0.40
codegen_flags: <defaults>
</compile_context>

<pallas_src>
import math

import jax
import jax.numpy as jnp
from jax.experimental import pallas as pl
from jax.experimental.pallas import tpu as pltpu

IN_FEATURES = 28 * 28   # 784
OUT_FEATURES = 10
DEFAULT_TB = 1024       # rows per grid step (f32 tile = 3.2 MB)
SUBLANE = 8             # f32 sublane alignment for the batch block dim


def linear_kernel(x_ref, w_ref, b_ref, o_ref):
    # MXU matmul in f32 with f32 accumulation; bias add on the VPU.
    acc = jnp.dot(x_ref[...], w_ref[...], preferred_element_type=jnp.float32)
    o_ref[...] = (acc + b_ref[...]).astype(o_ref.dtype)


def _round_up(n, m):
    return ((n + m - 1) // m) * m


def easy_model_forward(x, w, b, *, tb=DEFAULT_TB):
    """x: [B, 784] f32, w: [784, 10] f32, b: [1, 10] f32 -> [B, 10] f32."""
    B = x.shape[0]

    if B % SUBLANE != 0 and B <= tb:
        # Small / unaligned batch: one block covering the whole batch. The
        # block dim equals the full array dim, which satisfies the (8,128)
        # rule without padding or copying x.
        TB = B
        B_pad = B
    else:
        # Align the batch to the f32 sublane group (at most 7 extra rows, and
        # only when B is both large and unaligned -- the common training case
        # of B % 8 == 0 pays no copy at all).
        B_pad = _round_up(B, SUBLANE)
        if B_pad != B:
            x = jnp.pad(x, ((0, B_pad - B), (0, 0)))
        TB = min(tb, B_pad)
        # v7x megacore: make sure there are >= 2 grid steps when possible so
        # the "parallel" batch axis can be sharded across both TensorCores.
        if B_pad > SUBLANE:
            TB = min(TB, _round_up((B_pad + 1) // 2, SUBLANE))

    grid = (pl.cdiv(B_pad, TB),)

    x_f32 = x.astype(jnp.float32)
    w_f32 = w.astype(jnp.float32)
    b_f32 = b.astype(jnp.float32)

    cost = pl.CostEstimate(
        flops=2 * B_pad * IN_FEATURES * OUT_FEATURES,
        transcendentals=0,
        bytes_accessed=(B_pad * IN_FEATURES * 4           # x (f32)
                        + IN_FEATURES * OUT_FEATURES * 4   # w (f32)
                        + OUT_FEATURES * 4                 # b
                        + B_pad * OUT_FEATURES * 4),       # out (f32)
    )

    out = pl.pallas_call(
        linear_kernel,
        out_shape=jax.ShapeDtypeStruct((B_pad, OUT_FEATURES), jnp.float32),
        grid_spec=pltpu.PrefetchScalarGridSpec(
            num_scalar_prefetch=0,
            grid=grid,
            in_specs=[
                # x: tiled along batch; last dim equals full array dim (784).
                pl.BlockSpec((TB, IN_FEATURES), lambda i: (i, 0)),
                # w and b: same block every step -> stay resident in VMEM.
                pl.BlockSpec((IN_FEATURES, OUT_FEATURES), lambda i: (0, 0)),
                pl.BlockSpec((1, OUT_FEATURES), lambda i: (0, 0)),
            ],
            out_specs=pl.BlockSpec((TB, OUT_FEATURES), lambda i: (i, 0)),
        ),
        compiler_params=pltpu.CompilerParams(
            dimension_semantics=("parallel",)),
        cost_estimate=cost,
    )(x_f32, w_f32, b_f32)

    if B_pad != B:
        out = out[:B]
    return out


def init_params(key):
    # Deterministic init mimicking nn.Linear default: U(-k, k), k = 1/sqrt(fan_in)
    kw, kb = jax.random.split(key)
    bound = 1.0 / math.sqrt(IN_FEATURES)
    # PyTorch weight is [out, in]; store transposed [in, out] for the kernel.
    w = jax.random.uniform(kw, (IN_FEATURES, OUT_FEATURES), jnp.float32,
                           minval=-bound, maxval=bound)
    b = jax.random.uniform(kb, (1, OUT_FEATURES), jnp.float32,
                           minval=-bound, maxval=bound)
    return w, b


if __name__ == "__main__":
    key = jax.random.PRNGKey(0)
    kx, kp = jax.random.split(key)

    B = 2
    x = jax.random.normal(kx, (B, IN_FEATURES), jnp.float32)
    w, b = init_params(kp)

    out = easy_model_forward(x, w, b)
    jax.block_until_ready(out)

    # Full-f32 reference (kernel now dots in f32, so tolerances are tight).
    ref = x @ w + b
    assert out.shape == (B, OUT_FEATURES)
    assert jnp.allclose(out, ref, atol=1e-3, rtol=1e-3)

    # Exercise the tiled / ragged-last-block path as well.
    B2 = 600
    x2 = jax.random.normal(kx, (B2, IN_FEATURES), jnp.float32)
    out2 = easy_model_forward(x2, w, b)
    jax.block_until_ready(out2)
    assert out2.shape == (B2, OUT_FEATURES)
    assert jnp.allclose(out2, x2 @ w + b, atol=1e-3, rtol=1e-3)

    print("KERNEL_OK")
</pallas_src>

<mosaic_0001>
module attributes {stable_mosaic.version = 11 : i64} {
  func.func @linear_kernel(%arg0: i32, %arg1: memref<2x784xf32, #tpu.memory_space<vmem>>, %arg2: memref<784x10xf32, #tpu.memory_space<vmem>>, %arg3: memref<1x10xf32, #tpu.memory_space<vmem>>, %arg4: memref<2x10xf32, #tpu.memory_space<vmem>>) attributes {dimension_semantics = [#tpu.dimension_semantics<parallel>], iteration_bounds = array<i64: 1>, scalar_prefetch = 0 : i64, scratch_operands = 0 : i64, tpu.core_type = #tpu.core_type<tc>, window_params = [{transform_indices = @transform_0, window_bounds = array<i64: 2, 784>}, {pipeline_mode = #tpu.pipeline_mode<synchronous>, transform_indices = @transform_1, window_bounds = array<i64: 784, 10>}, {pipeline_mode = #tpu.pipeline_mode<synchronous>, transform_indices = @transform_2, window_bounds = array<i64: 1, 10>}, {transform_indices = @transform_3, window_bounds = array<i64: 2, 10>}]} {
    %c0 = arith.constant 0 : index
    %c0_0 = arith.constant 0 : index
    %0 = vector.load %arg1[%c0, %c0_0] : memref<2x784xf32, #tpu.memory_space<vmem>>, vector<2x784xf32>
    %c0_1 = arith.constant 0 : index
    %c0_2 = arith.constant 0 : index
    %1 = vector.load %arg2[%c0_1, %c0_2] : memref<784x10xf32, #tpu.memory_space<vmem>>, vector<784x10xf32>
    %cst = arith.constant dense<0.000000e+00> : vector<2x10xf32>
    %2 = tpu.matmul %0, %1, %cst {dimension_numbers = #tpu.dot_dimension_numbers<[1], [0], [0], [1], [0, 0, 1, 1], [], []>} : vector<2x784xf32>, vector<784x10xf32>, vector<2x10xf32> -> vector<2x10xf32>
    %c0_3 = arith.constant 0 : index
    %c0_4 = arith.constant 0 : index
    %3 = vector.load %arg3[%c0_3, %c0_4] : memref<1x10xf32, #tpu.memory_space<vmem>>, vector<1x10xf32>
    %4 = vector.broadcast %3 : vector<1x10xf32> to vector<2x10xf32>
    %5 = arith.addf %2, %4 : vector<2x10xf32>
    %c0_5 = arith.constant 0 : index
    %c0_6 = arith.constant 0 : index
    %6 = vector.load %arg4[%c0_5, %c0_6] : memref<2x10xf32, #tpu.memory_space<vmem>>, vector<2x10xf32>
    tpu.vector_store %arg4[%c0_5, %c0_6], %5 {strides = array<i32>} : memref<2x10xf32, #tpu.memory_space<vmem>>, vector<2x10xf32>,
    return
  }
  func.func @transform_0(%arg0: i32) -> (i32, i32) {
    %c0_i32 = arith.constant 0 : i32
    %c0_i32_0 = arith.constant 0 : i32
    return %arg0, %c0_i32 : i32, i32
  }
  func.func @transform_1(%arg0: i32) -> (i32, i32) {
    %c0_i32 = arith.constant 0 : i32
    %c0_i32_0 = arith.constant 0 : i32
    %c0_i32_1 = arith.constant 0 : i32
    return %c0_i32, %c0_i32_0 : i32, i32
  }
  func.func @transform_2(%arg0: i32) -> (i32, i32) {
    %c0_i32 = arith.constant 0 : i32
    %c0_i32_0 = arith.constant 0 : i32
    %c0_i32_1 = arith.constant 0 : i32
    return %c0_i32, %c0_i32_0 : i32, i32
  }
  func.func @transform_3(%arg0: i32) -> (i32, i32) {
    %c0_i32 = arith.constant 0 : i32
    %c0_i32_0 = arith.constant 0 : i32
    return %arg0, %c0_i32 : i32, i32
  }
}

</mosaic_0001>

<bundles_post_ra>
// kernel: tpu_custom_call.1
= control target key start
LH: loop header
LB: loop body
LE: loop exit
PB: predicated region body
PF: predicated region fallthrough
CT: control target
= control target key end

     0   :  { %s654_s0 = inlined_call_operand.vmem [shape: f32[2,784], index: 0, kind: input, shape index: {}]   ;;  %s655_s1 = inlined_call_operand.vmem [shape: f32[784,10], index: 1, kind: input, shape index: {}]   ;;  %s656_s2 = inlined_call_operand.vmem [shape: f32[1,10], index: 2, kind: input, shape index: {}]   ;;  %s657_s3 = inlined_call_operand.hbm [shape: f32[2,10], index: 3, kind: output, shape index: {}]  }
   0x1   :  { %v32_v0 = vld [vmem:[%s655_s1 + $0x78] sm:$0xff]  ;;  %v31_v1 = vld [vmem:[%s655_s1 + $0x70] sm:$0xff]  ;;  %v30_v4 = vld [vmem:[%s655_s1 + $0x68] sm:$0xff] }
   0x2   :  { %v48_v2 = vld [vmem:[%s655_s1 + $0xf8] sm:$0xff]  ;;  %140 = vmatpush.msra.mxu0 %v32_v0  ;;  %v47_v3 = vld [vmem:[%s655_s1 + $0xf0] sm:$0xff]  ;;  %v46_v5 = vld [vmem:[%s655_s1 + $0xe8] sm:$0xff] }
   0x3   :  { %160 = vmatpush.msra.mxu1 %v48_v2  ;;  %v29_v6 = vld [vmem:[%s655_s1 + $0x60] sm:$0xff]  ;;  %v28_v8 = vld [vmem:[%s655_s1 + $0x58] sm:$0xff]  ;;  %v27_v10 = vld [vmem:[%s655_s1 + $0x50] sm:$0xff] }
   0x4   :  { %141 = vmatpush.msra.mxu0 %v31_v1  ;;  %v45_v7 = vld [vmem:[%s655_s1 + $0xe0] sm:$0xff]  ;;  %v44_v9 = vld [vmem:[%s655_s1 + $0xd8] sm:$0xff]  ;;  %v43_v12 = vld [vmem:[%s655_s1 + $0xd0] sm:$0xff] }
   0x5   :  { %161 = vmatpush.msra.mxu1 %v47_v3  ;;  %v64_v11 = vld [vmem:[%s655_s1 + $0x178] sm:$0xff]  ;;  %v63_v13 = vld [vmem:[%s655_s1 + $0x170] sm:$0xff]  ;;  %v62_v15 = vld [vmem:[%s655_s1 + $0x168] sm:$0xff] }
   0x6   :  { %142 = vmatpush.msra.mxu0 %v30_v4  ;;  %180 = vmatpush.msra.mxu2 %v64_v11  ;;  %v80_v14 = vld [vmem:[%s655_s1 + $0x1f8] sm:$0xff]  ;;  %v79_v16 = vld [vmem:[%s655_s1 + $0x1f0] sm:$0xff]  ;;  %v26_v17 = vld [vmem:[%s655_s1 + $0x48] sm:$0xff] }
   0x7   :  { %162 = vmatpush.msra.mxu1 %v46_v5  ;;  %v42_v18 = vld [vmem:[%s655_s1 + $0xc8] sm:$0xff]  ;;  %200 = vmatpush.msra.mxu3 %v80_v14  ;;  %v61_v19 = vld [vmem:[%s655_s1 + $0x160] sm:$0xff]  ;;  %v60_v23 = vld [vmem:[%s655_s1 + $0x158] sm:$0xff] }
   0x8   :  { %143 = vmatpush.msra.mxu0 %v29_v6  ;;  %181 = vmatpush.msra.mxu2 %v63_v13  ;;  %v78_v20 = vld [vmem:[%s655_s1 + $0x1e8] sm:$0xff]  ;;  %v25_v21 = vld [vmem:[%s655_s1 + $0x40] sm:$0xff]  ;;  %v24_v25 = vld [vmem:[%s655_s1 + $0x38] sm:$0xff] }
   0x9   :  { %163 = vmatpush.msra.mxu1 %v45_v7  ;;  %v41_v22 = vld [vmem:[%s655_s1 + $0xc0] sm:$0xff]  ;;  %201 = vmatpush.msra.mxu3 %v79_v16  ;;  %v40_v26 = vld [vmem:[%s655_s1 + $0xb8] sm:$0xff]  ;;  %v59_v27 = vld [vmem:[%s655_s1 + $0x150] sm:$0xff] }
   0xa   :  { %144 = vmatpush.msra.mxu0 %v28_v8  ;;  %182 = vmatpush.msra.mxu2 %v62_v15  ;;  %v77_v24 = vld [vmem:[%s655_s1 + $0x1e0] sm:$0xff]  ;;  %v76_v28 = vld [vmem:[%s655_s1 + $0x1d8] sm:$0xff]  ;;  %v23_v29 = vld [vmem:[%s655_s1 + $0x30] sm:$0xff] }
   0xb   :  { %164 = vmatpush.msra.mxu1 %v44_v9  ;;  %202 = vmatpush.msra.mxu3 %v78_v20  ;;  %v39_v30 = vld [vmem:[%s655_s1 + $0xb0] sm:$0xff]  ;;  %v58_v31 = vld [vmem:[%s655_s1 + $0x148] sm:$0xff]  ;;  %v57_v35 = vld [vmem:[%s655_s1 + $0x140] sm:$0xff] }
   0xc   :  { %145 = vmatpush.msra.mxu0 %v27_v10  ;;  %183 = vmatpush.msra.mxu2 %v61_v19  ;;  %v75_v32 = vld [vmem:[%s655_s1 + $0x1d0] sm:$0xff]  ;;  %v22_v33 = vld [vmem:[%s655_s1 + $0x28] sm:$0xff]  ;;  %v21_v37 = vld [vmem:[%s655_s1 + $0x20] sm:$0xff] }
   0xd   :  { %165 = vmatpush.msra.mxu1 %v43_v12  ;;  %203 = vmatpush.msra.mxu3 %v77_v24  ;;  %v38_v34 = vld [vmem:[%s655_s1 + $0xa8] sm:$0xff]  ;;  %v37_v38 = vld [vmem:[%s655_s1 + $0xa0] sm:$0xff]  ;;  %v56_v39 = vld [vmem:[%s655_s1 + $0x138] sm:$0xff] }
   0xe   :  { %146 = vmatpush.msra.mxu0 %v26_v17  ;;  %184 = vmatpush.msra.mxu2 %v60_v23  ;;  %v74_v36 = vld [vmem:[%s655_s1 + $0x1c8] sm:$0xff]  ;;  %v73_v40 = vld [vmem:[%s655_s1 + $0x1c0] sm:$0xff]  ;;  %v20_v41 = vld [vmem:[%s655_s1 + $0x18] sm:$0xff] }
   0xf   :  { %166 = vmatpush.msra.mxu1 %v42_v18  ;;  %204 = vmatpush.msra.mxu3 %v76_v28  ;;  %v36_v42 = vld [vmem:[%s655_s1 + $0x98] sm:$0xff]  ;;  %v55_v43 = vld [vmem:[%s655_s1 + $0x130] sm:$0xff]  ;;  %v54_v47 = vld [vmem:[%s655_s1 + $0x128] sm:$0xff] }
  0x10   :  { %147 = vmatpush.msra.mxu0 %v25_v21  ;;  %185 = vmatpush.msra.mxu2 %v59_v27  ;;  %v72_v44 = vld [vmem:[%s655_s1 + $0x1b8] sm:$0xff]  ;;  %v19_v45 = vld [vmem:[%s655_s1 + $0x10] sm:$0xff]  ;;  %v18_v49 = vld [vmem:[%s655_s1 + $0x8] sm:$0xff] }
  0x11   :  { %167 = vmatpush.msra.mxu1 %v41_v22  ;;  %205 = vmatpush.msra.mxu3 %v75_v32  ;;  %v35_v46 = vld [vmem:[%s655_s1 + $0x90] sm:$0xff]  ;;  %v34_v50 = vld [vmem:[%s655_s1 + $0x88] sm:$0xff]  ;;  %v53_v51 = vld [vmem:[%s655_s1 + $0x120] sm:$0xff] }
  0x12   :  { %148 = vmatpush.msra.mxu0 %v24_v25  ;;  %186 = vmatpush.msra.mxu2 %v58_v31  ;;  %v71_v48 = vld [vmem:[%s655_s1 + $0x1b0] sm:$0xff]  ;;  %v70_v52 = vld [vmem:[%s655_s1 + $0x1a8] sm:$0xff]  ;;  %v17_v53 = vld [vmem:[%s655_s1] sm:$0xff] }
  0x13   :  { %168 = vmatpush.msra.mxu1 %v40_v26  ;;  %206 = vmatpush.msra.mxu3 %v74_v36  ;;  %v33_v54 = vld [vmem:[%s655_s1 + $0x80] sm:$0xff]  ;;  %v96_v56 = vld [vmem:[%s655_s1 + $0x278] sm:$0xff]  ;;  %v95_v60 = vld [vmem:[%s655_s1 + $0x270] sm:$0xff] }
  0x14   :  { %149 = vmatpush.msra.mxu0 %v23_v29  ;;  %187 = vmatpush.msra.mxu2 %v57_v35  ;;  %v15_v55 = vld [vmem:[%s654_s0] sm:$0xff]  ;;  %v112_v57 = vld [vmem:[%s655_s1 + $0x2f8] sm:$0xff]  ;;  %v111_v61 = vld [vmem:[%s655_s1 + $0x2f0] sm:$0xff] }
  0x15   :  { %169 = vmatpush.msra.mxu1 %v39_v30  ;;  %207 = vmatpush.msra.mxu3 %v73_v40  ;;  %121 = vst [vmem:[#allocation1] ss:$4 sm:$0xff] %v15_v55  ;;  %v52_v58 = vld [vmem:[%s655_s1 + $0x118] sm:$0xff]  ;;  %v69_v59 = vld [vmem:[%s655_s1 + $0x1a0] sm:$0xff]  ;;  %v51_v62 = vld [vmem:[%s655_s1 + $0x110] sm:$0xff] }
  0x16   :  { %150 = vmatpush.msra.mxu0 %v22_v33  ;;  %188 = vmatpush.msra.mxu2 %v56_v39  ;;  %v68_v63 = vld [vmem:[%s655_s1 + $0x198] sm:$0xff]  ;;  %v16_v0 = vld [vmem:[%s654_s0 + $0x8] sm:$0x3f]  ;;  %v67_v4 = vld [vmem:[%s655_s1 + $0x190] sm:$0xff] }
  0x17   :  { %170 = vmatpush.msra.mxu1 %v38_v34  ;;  %208 = vmatpush.msra.mxu3 %v72_v44  ;;  %v94_v1 = vld [vmem:[%s655_s1 + $0x268] sm:$0xff]  ;;  %123 = vst [vmem:[#allocation1 + $0x20] ss:$4 sm:$0xff] %v16_v0 }
  0x18   :  { %151 = vmatpush.msra.mxu0 %v21_v37  ;;  %189 = vmatpush.msra.mxu2 %v55_v43  ;;  %v110_v2 = vld [vmem:[%s655_s1 + $0x2e8] sm:$0xff] }
  0x19   :  { %171 = vmatpush.msra.mxu1 %v37_v38  ;;  %209 = vmatpush.msra.mxu3 %v71_v48  ;;  %v50_v3 = vld [vmem:[%s655_s1 + $0x108] sm:$0xff] }
  0x1a   :  { %152 = vmatpush.msra.mxu0 %v20_v41  ;;  %190 = vmatpush.msra.mxu2 %v54_v47 }
  0x1b   :  { %172 = vmatpush.msra.mxu1 %v36_v42  ;;  %210 = vmatpush.msra.mxu3 %v70_v52 }
  0x1c   :  { %153 = vmatpush.msra.mxu0 %v19_v45  ;;  %191 = vmatpush.msra.mxu2 %v53_v51 }
  0x1d   :  { %173 = vmatpush.msra.mxu1 %v35_v46  ;;  %211 = vmatpush.msra.mxu3 %v69_v59 }
  0x1e   :  { %154 = vmatpush.msra.mxu0 %v18_v49  ;;  %192 = vmatpush.msra.mxu2 %v52_v58 }
  0x1f   :  { %174 = vmatpush.msra.mxu1 %v34_v50 }
  0x20   :  { %155 = vmatpush.msra.mxu0 %v17_v53 }
  0x21   :  { %175 = vmatpush.msra.mxu1 %v33_v54 }
  0x22   :  { %220 = vmatpush.msrb.mxu0 %v96_v56 }
  0x23   :  { %240 = vmatpush.msrb.mxu1 %v112_v57 }
  0x24   :  { %221 = vmatpush.msrb.mxu0 %v95_v60 }
  0x25   :  { %241 = vmatpush.msrb.mxu1 %v111_v61 }
  0x26   :  { %8 = vsyncpa [#allocation3], 0  ;;  %v93_v5 = vld [vmem:[%s655_s1 + $0x260] sm:$0xff]  ;;  %193 = vmatpush.msra.mxu2 %v51_v62  ;;  %212 = vmatpush.msra.mxu3 %v68_v63  ;;  %v66_v8 = vld [vmem:[%s655_s1 + $0x188] sm:$0xff]  ;;  %vm137_vm0 = vcmask 130048   ;;  %s289_s25 = sshll.u32 %s657_s3, 4  ;;  %s290_s25 = int_to_ptr.hbm [resolvable:$true] %s289_s25 }
  0x27   :  { %v109_v6 = vld [vmem:[%s655_s1 + $0x2e0] sm:$0xff]  ;;  %222 = vmatpush.msrb.mxu0 %v94_v1  ;;  %242 = vmatpush.msrb.mxu1 %v110_v2  ;;  %v92_v9 = vld [vmem:[%s655_s1 + $0x258] sm:$0xff]  ;;  %v126_v11 = vld.sshfl [vmem:[#allocation1 + $0x10] sm:$0xff pattern:$0x73625140]  ;;  %vm280_vm1 = vcmask 74752  }
  0x28   :  { %v49_v7 = vld [vmem:[%s655_s1 + $0x100] sm:$0xff]  ;;  %v108_v10 = vld [vmem:[%s655_s1 + $0x2d8] sm:$0xff]  ;;  %194 = vmatpush.msra.mxu2 %v50_v3  ;;  %213 = vmatpush.msra.mxu3 %v67_v4  ;;  %v91_v13 = vld [vmem:[%s655_s1 + $0x250] sm:$0xff] }
  0x29   :  { %223 = vmatpush.msrb.mxu0 %v93_v5  ;;  %243 = vmatpush.msrb.mxu1 %v109_v6  ;;  %v65_v12 = vld [vmem:[%s655_s1 + $0x180] sm:$0xff]  ;;  %v107_v14 = vld [vmem:[%s655_s1 + $0x2d0] sm:$0xff]  ;;  %v114_v15 = vld [vmem:[%s655_s1 + $0x308] sm:$0xff] }
  0x2a   :  { %195 = vmatpush.msra.mxu2 %v49_v7  ;;  %214 = vmatpush.msra.mxu3 %v66_v8  ;;  %v124_v16 = vld.sshfl [vmem:[#allocation1] sm:$0xff pattern:$0x73625140]  ;;  %v90_v17 = vld [vmem:[%s655_s1 + $0x248] sm:$0xff]  ;;  %v88_v24 = vld [vmem:[%s655_s1 + $0x238] sm:$0xff] }
  0x2b   :  { %224 = vmatpush.msrb.mxu0 %v92_v9  ;;  %244 = vmatpush.msrb.mxu1 %v108_v10  ;;  %v106_v18 = vld [vmem:[%s655_s1 + $0x2c8] sm:$0xff]  ;;  %v127_v19 = vld.sshfl [vmem:[#allocation1 + $0x18] sm:$0xff pattern:$0x73625140]  ;;  %v89_v21 = vld [vmem:[%s655_s1 + $0x240] sm:$0xff] }
  0x2c   :  { %196 = vmatmul.f32.vlgmr.msra.gmra.mxu2 %v126_v11  ;;  %215 = vmatpush.msra.mxu3 %v65_v12  ;;  %v125_v20 = vld.sshfl [vmem:[#allocation1 + $0x8] sm:$0xff pattern:$0x73625140]  ;;  %v105_v22 = vld [vmem:[%s655_s1 + $0x2c0] sm:$0xff]  ;;  %v104_v25 = vld [vmem:[%s655_s1 + $0x2b8] sm:$0xff] }
  0x2d   :  { %225 = vmatpush.msrb.mxu0 %v91_v13  ;;  %245 = vmatpush.msrb.mxu1 %v107_v14  ;;  %v113_v23 = vld [vmem:[%s655_s1 + $0x300] sm:$0xff]  ;;  %v130_v26 = vld.sshfl [vmem:[#allocation1 + $0x30] sm:$0xff pattern:$0x73625140]  ;;  %v86_v29 = vld [vmem:[%s655_s1 + $0x228] sm:$0xff] }
  0x2e   :  { %274 = vmatpush.msrb.mxu2 %v114_v15  ;;  %156 = vmatmul.f32.vlgmr.msra.gmra.mxu0 %v124_v16  ;;  %v87_v27 = vld [vmem:[%s655_s1 + $0x230] sm:$0xff]  ;;  %v102_v30 = vld [vmem:[%s655_s1 + $0x2a8] sm:$0xff]  ;;  %v85_v31 = vld [vmem:[%s655_s1 + $0x220] sm:$0xff] }
  0x2f   :  { %226 = vmatpush.msrb.mxu0 %v90_v17  ;;  %246 = vmatpush.msrb.mxu1 %v106_v18  ;;  %v103_v28 = vld [vmem:[%s655_s1 + $0x2b0] sm:$0xff]  ;;  %v101_v32 = vld [vmem:[%s655_s1 + $0x2a0] sm:$0xff]  ;;  %v84_v33 = vld [vmem:[%s655_s1 + $0x218] sm:$0xff] }
  0x30   :  { %216 = vmatmul.f32.vlgmr.msra.gmra.mxu3 %v127_v19  ;;  %176 = vmatmul.f32.vlgmr.msra.gmra.mxu1 %v125_v20  ;;  %v100_v34 = vld [vmem:[%s655_s1 + $0x298] sm:$0xff]  ;;  %v83_v35 = vld [vmem:[%s655_s1 + $0x210] sm:$0xff]  ;;  %v82_v37 = vld [vmem:[%s655_s1 + $0x208] sm:$0xff] }
  0x31   :  { %227 = vmatpush.msrb.mxu0 %v89_v21  ;;  %247 = vmatpush.msrb.mxu1 %v105_v22  ;;  %v99_v36 = vld [vmem:[%s655_s1 + $0x290] sm:$0xff]  ;;  %v98_v38 = vld [vmem:[%s655_s1 + $0x288] sm:$0xff]  ;;  %v81_v39 = vld [vmem:[%s655_s1 + $0x200] sm:$0xff] }
  0x32   :  { %275 = vmatpush.msrb.mxu2 %v113_v23  ;;  %v97_v40 = vld [vmem:[%s655_s1 + $0x280] sm:$0xff]  ;;  %v129_v42 = vld.sshfl [vmem:[#allocation1 + $0x28] sm:$0xff pattern:$0x73625140]  ;;  %s327_s1 = smov [#allocation2]  }
  0x33   :  { %228 = vmatpush.msrb.mxu0 %v88_v24  ;;  %248 = vmatpush.msrb.mxu1 %v104_v25  ;;  %v128_v41 = vld.sshfl [vmem:[#allocation1 + $0x20] sm:$0xff pattern:$0x73625140]  ;;  %s287_s22 = sshll.u32 %s327_s1, 4  ;;  %s288_s22 = int_to_ptr.vmem [resolvable:$true] %s287_s22 }
  0x34   :  { %298 = vmatmul.msk.f32.vlgmr.msrb.gmra.mxu2 %vm137_vm0, %v130_v26  ;;  %v300_v43 = vld [vmem:[%s656_s2] ss:$0 sm:$0xff] }
  0x35   :  { %229 = vmatpush.msrb.mxu0 %v87_v27  ;;  %249 = vmatpush.msrb.mxu1 %v103_v28 }
  0x37   :  { %230 = vmatpush.msrb.mxu0 %v86_v29  ;;  %250 = vmatpush.msrb.mxu1 %v102_v30 }
  0x39   :  { %231 = vmatpush.msrb.mxu0 %v85_v31  ;;  %251 = vmatpush.msrb.mxu1 %v101_v32 }
  0x3b   :  { %232 = vmatpush.msrb.mxu0 %v84_v33  ;;  %252 = vmatpush.msrb.mxu1 %v100_v34 }
  0x3d   :  { %233 = vmatpush.msrb.mxu0 %v83_v35  ;;  %253 = vmatpush.msrb.mxu1 %v99_v36 }
  0x3f   :  { %234 = vmatpush.msrb.mxu0 %v82_v37  ;;  %254 = vmatpush.msrb.mxu1 %v98_v38 }
  0x41   :  { %235 = vmatpush.msrb.mxu0 %v81_v39  ;;  %255 = vmatpush.msrb.mxu1 %v97_v40 }
  0x42   :  { %236 = vmatmul.f32.vlgmr.msrb.gmra.mxu0 %v128_v41  ;;  %256 = vmatmul.f32.vlgmr.msrb.gmra.mxu1 %v129_v42 }
  0xab   :  { %v157_v44 = vpop.f32.mrf.mxu0 }
  0xac   :  { %v158_v45 = vadd.f32 %v300_v43, %v157_v44 }
  0xad   :  { %v177_v46 = vpop.f32.mrf.mxu1 }
  0xae   :  { %v178_v47 = vadd.f32 %v177_v46, %v158_v45 }
  0xaf   :  { %v197_v48 = vpop.f32.mrf.mxu2 }
  0xb0   :  { %v198_v49 = vadd.f32 %v197_v48, %v178_v47 }
  0xb3   :  { %v217_v50 = vpop.f32.mrf.mxu3 }
  0xb4   :  { %v218_v51 = vadd.f32 %v217_v50, %v198_v49 }
  0xb7   :  { %v277_v55 = vpop.f32.mrf.mxu2 }
  0xbf   :  { %v237_v52 = vpop.f32.mrf.mxu0  ;;  %v257_v53 = vpop.f32.mrf.mxu1 }
  0xc0   :  { %v238_v54 = vadd.f32 %v237_v52, %v218_v51 }
  0xc2   :  { %v258_v56 = vadd.f32 %v257_v53, %v238_v54 }
  0xc4   :  { %v278_v57 = vadd.f32 %v277_v55, %v258_v56 }
  0xc6   :  { %281 = vst.msk [vmem:[#allocation2] sm:$0x3] %vm280_vm1, %v278_v57 }
  0xc7   :  { %292 = dma.vmem_to_hbm [thread:$0]  %s288_s22, 32, %s290_s25, [#allocation3]  }
  0xc8   :  { %325 = dma.done.wait [#allocation3], 32  }
  0xc9   :  { %326 = vsyncadd [#allocation3], 4294967264 }
  0xca   :  { %297 = vsyncpa [#allocation3], 1 }

</bundles_post_ra>
